<compile_context>
chip_gen: v5e
topology: v5e:2x2
jax: 0.10.0
libtpu: 0.0.40
codegen_flags: <defaults>
</compile_context>

<pallas_src>
import functools

import jax
import jax.numpy as jnp
import numpy as np
from jax.experimental import pallas as pl
from jax.experimental.pallas import tpu as pltpu


# ------------------------------- helpers -------------------------------------
def _round_up(x, m):
    return (x + m - 1) // m * m


def _cdiv(a, b):
    return (a + b - 1) // b


def _dff_chunk(dff, factor=128, cap=512):
    """Largest divisor of dff that is a multiple of `factor` and <= cap."""
    best = None
    d = factor
    while d <= min(dff, cap):
        if dff % d == 0:
            best = d
        d += factor
    # TODO(synk): for large Dff not divisible by 128 this falls back to a single
    # full-width chunk; a masked padded chunk would bound VMEM better.
    return best if best is not None else dff


def _vmem_budget_bytes():
    """~85% of physical VMEM: ~108 MiB on v5e/v6e (128 MiB), ~54 MiB on v7x."""
    cap = 128 << 20
    try:
        info = pltpu.get_tpu_info()
        cap = int(getattr(info, "vmem_capacity_bytes", cap))
    except Exception:
        pass
    return max(32 << 20, int(0.85 * cap))


# ----------------------------- gate (router) kernel --------------------------
def _gate_kernel(x_ref, wgt_ref, o_ref):
    # router_logits = x @ Wg.T   (Wg.T pre-transposed to (H, E)); f32 output.
    o_ref[...] = jnp.dot(x_ref[...].astype(jnp.float32), wgt_ref[...],
                         preferred_element_type=jnp.float32)


def gate_logits(x, wg_t):
    T, H = x.shape
    E = wg_t.shape[1]
    tm = 256 if T >= 256 else _round_up(T, 8)
    t_pad = _round_up(T, tm)
    x_p = x if t_pad == T else jnp.pad(x, ((0, t_pad - T), (0, 0)))
    out = pl.pallas_call(
        _gate_kernel,
        out_shape=jax.ShapeDtypeStruct((t_pad, E), jnp.float32),
        grid=(t_pad // tm,),
        in_specs=[
            pl.BlockSpec((tm, H), lambda t: (t, 0)),
            pl.BlockSpec((H, E), lambda t: (0, 0)),
        ],
        out_specs=pl.BlockSpec((tm, E), lambda t: (t, 0)),
        compiler_params=pltpu.CompilerParams(dimension_semantics=("parallel",)),
    )(x_p, wg_t)
    return out[:T]


# ------------------------- routing / group metadata (XLA) ---------------------
def _routing_and_groups(router_logits, gate_dtype, T, E, top_k, tm, n_tiles):
    """Sort (token, slot) pairs by expert, pad each group to a tile boundary."""
    if top_k == 1:
        w = jnp.max(router_logits, axis=-1, keepdims=True)
        idx = jnp.argmax(router_logits, axis=-1)[:, None]
    else:
        w, idx = jax.lax.top_k(router_logits, top_k)
    w = jax.nn.softmax(w.astype(jnp.float32), axis=-1).astype(gate_dtype)   # (T,k)

    N = T * top_k
    flat_e = idx.reshape(-1).astype(jnp.int32)                 # (N,)
    flat_g = w.reshape(-1)                                     # (N,)

    sort_idx = jnp.argsort(flat_e).astype(jnp.int32)           # stable
    sorted_e = flat_e[sort_idx]
    batch_index = (sort_idx // top_k).astype(jnp.int32)        # source token row
    batch_gates = flat_g[sort_idx]

    counts = jnp.bincount(flat_e, length=E).astype(jnp.int32)  # (E,)
    zero = jnp.zeros((1,), jnp.int32)
    group_off = jnp.concatenate([zero, jnp.cumsum(counts)]).astype(jnp.int32)
    tiles_per_e = (counts + tm - 1) // tm
    tile_start = jnp.concatenate([zero, jnp.cumsum(tiles_per_e)]).astype(jnp.int32)

    tile_ids = jnp.arange(n_tiles, dtype=jnp.int32)
    tile_expert = jnp.minimum(
        jnp.searchsorted(tile_start[1:], tile_ids, side="right"), E - 1
    ).astype(jnp.int32)
    tile_valid = (tile_ids < tile_start[E]).astype(jnp.int32)

    rank = jnp.arange(N, dtype=jnp.int32) - group_off[sorted_e]
    padded_pos = tile_start[sorted_e] * tm + rank              # unique positions

    n_pad = n_tiles * tm
    padded_token = jnp.full((n_pad,), T, jnp.int32).at[padded_pos].set(batch_index)
    padded_gates = jnp.zeros((n_pad,), flat_g.dtype).at[padded_pos].set(batch_gates)
    return tile_expert, tile_valid, padded_token, padded_gates


# -------------------------- grouped expert GEMM kernel ------------------------
def _moe_expert_kernel(tile_e_ref, tile_v_ref, x_ref, w1_ref, b1_ref,
                       w2_ref, b2_ref, g_ref, out_ref, acc_ref):
    t = pl.program_id(0)          # token-tile index (one expert per tile)
    c = pl.program_id(1)          # Dff chunk index

    @pl.when(c == 0)
    def _():
        # fold c_proj bias into the accumulator once per tile
        acc_ref[...] = jnp.broadcast_to(b2_ref[0].astype(jnp.float32),
                                        acc_ref.shape)

    @pl.when(tile_v_ref[t] != 0)  # skip MXU/EUP work on empty tiles
    def _():
        x = x_ref[...]                                         # (TM, H)  bf16
        h = jnp.dot(x, w1_ref[0], preferred_element_type=jnp.float32)
        h = h + b1_ref[0].astype(jnp.float32)
        h = jax.nn.gelu(h, approximate=True)                   # tanh-approx gelu
        acc_ref[...] += jnp.dot(h.astype(x.dtype), w2_ref[0],
                                preferred_element_type=jnp.float32)

    @pl.when(c == pl.num_programs(1) - 1)
    def _():
        g = g_ref[...].astype(jnp.float32)                     # (TM, 1) gate
        out_ref[...] = (g * acc_ref[...]).astype(out_ref.dtype)


def moe_experts_grouped(xs, w1_t, b1, w2_t, b2, gates, tile_expert, tile_valid,
                        *, tm, dc, out_dtype, vmem_limit):
    n_pad, H = xs.shape
    E, _, Dff = w1_t.shape
    n_tiles = n_pad // tm
    n_c = Dff // dc

    b1r = b1.reshape(E, 1, Dff)
    b2r = b2.reshape(E, 1, H)
    g_r = gates.reshape(n_pad, 1)

    wbytes = jnp.dtype(w1_t.dtype).itemsize
    xbytes = jnp.dtype(xs.dtype).itemsize
    obytes = jnp.dtype(out_dtype).itemsize
    cost = pl.CostEstimate(
        flops=int(4 * n_pad * H * Dff),
        transcendentals=int(n_pad * Dff),
        bytes_accessed=int(n_tiles * 2 * H * Dff * wbytes
                           + n_pad * H * (xbytes + obytes)),
    )

    grid_spec = pltpu.PrefetchScalarGridSpec(
        num_scalar_prefetch=2,                       # tile_expert, tile_valid
        grid=(n_tiles, n_c),
        in_specs=[
            pl.BlockSpec((tm, H), lambda t, c, te, tv: (t, 0)),            # xs
            pl.BlockSpec((1, H, dc), lambda t, c, te, tv: (te[t], 0, c)),  # w1_t
            pl.BlockSpec((1, 1, dc), lambda t, c, te, tv: (te[t], 0, c)),  # b1
            pl.BlockSpec((1, dc, H), lambda t, c, te, tv: (te[t], c, 0)),  # w2_t
            pl.BlockSpec((1, 1, H), lambda t, c, te, tv: (te[t], 0, 0)),   # b2
            pl.BlockSpec((tm, 1), lambda t, c, te, tv: (t, 0)),            # gates
        ],
        out_specs=pl.BlockSpec((tm, H), lambda t, c, te, tv: (t, 0)),
        scratch_shapes=[pltpu.VMEM((tm, H), jnp.float32)],                 # f32 acc
    )
    return pl.pallas_call(
        _moe_expert_kernel,
        out_shape=jax.ShapeDtypeStruct((n_pad, H), out_dtype),
        grid_spec=grid_spec,
        compiler_params=pltpu.CompilerParams(
            dimension_semantics=("parallel", "arbitrary"),
            vmem_limit_bytes=int(vmem_limit)),
        cost_estimate=cost,
    )(tile_expert, tile_valid, xs, w1_t, b1r, w2_t, b2r, g_r)


# ---------------------------------- module ------------------------------------
class MoEPallas:
    def __init__(self, num_experts, num_experts_per_tok, hidden_size,
                 intermediate_size, std, key, param_dtype=jnp.bfloat16):
        self.num_experts = num_experts
        self.top_k = num_experts_per_tok
        self.hidden_size = hidden_size
        self.intermediate_size = intermediate_size
        kg, k1, k2 = jax.random.split(key, 3)
        H, I, E = hidden_size, intermediate_size, num_experts

        # PyTorch nn.Linear layouts (f32 masters, kept for the reference path)
        self.wg = jax.random.normal(kg, (E, H), jnp.float32) * (1.0 / np.sqrt(H))
        self.w1 = jax.random.normal(k1, (E, I, H), jnp.float32) * std   # c_fc
        self.b1 = jnp.zeros((E, I), jnp.float32)
        self.w2 = jax.random.normal(k2, (E, H, I), jnp.float32) * std   # c_proj
        self.b2 = jnp.zeros((E, H), jnp.float32)

        # One-time host transposes for clean (M,K)x(K,N) MXU feeding.
        # Router weights stay f32 (exact top-k); expert weights in param_dtype
        # (bf16 by default -> 2-4x MXU throughput, half the weight DMA).
        self.wg_t = jnp.asarray(self.wg.T, jnp.float32)                           # (H, E)
        self.w1_t = jnp.asarray(jnp.transpose(self.w1, (0, 2, 1)), param_dtype)   # (E, H, I)
        self.w2_t = jnp.asarray(jnp.transpose(self.w2, (0, 2, 1)), param_dtype)   # (E, I, H)

        # Per-generation VMEM budget (queried once, outside jit).
        self.vmem_budget = _vmem_budget_bytes()

    @functools.partial(jax.jit, static_argnums=0)
    def __call__(self, hidden_states):
        original_shape = hidden_states.shape
        x = hidden_states.reshape(-1, self.hidden_size)
        T, H = x.shape
        E, Dff, k = self.num_experts, self.intermediate_size, self.top_k
        N = T * k                                   # routed rows (top_k, not E!)

        # ---- static per-generation tile plan ----
        budget = self.vmem_budget
        dc = _dff_chunk(Dff)
        tm_target = 1024 if budget >= (96 << 20) else 512    # v5e/v6e vs v7x
        tm = max(8, min(tm_target, _round_up(N, 8)))
        if N > 8:                                   # keep >=2 busy tiles (v7x 2 TCs)
            tm = min(tm, max(8, _round_up(_cdiv(N, 2), 8)))
        cbytes = jnp.dtype(self.w1_t.dtype).itemsize
        obytes = jnp.dtype(x.dtype).itemsize

        def _est(tm_):
            return (2 * tm_ * H * cbytes                       # xs tiles (x2 buf)
                    + 2 * tm_ * H * obytes                     # out tiles (x2 buf)
                    + tm_ * H * 4                              # f32 accumulator
                    + 2 * (H * dc + dc * H) * cbytes           # weight chunks (x2)
                    + 2 * (dc + H) * 4                         # bias chunks
                    + 4 * tm_ * 4)                             # gate tiles
        while tm > 8 and _est(tm) > int(0.8 * budget):
            tm = max(8, _round_up(tm // 2, 8))

        n_tiles = _cdiv(N, tm) + E                  # safe static upper bound
        n_pad = n_tiles * tm

        # ---- router (f32 logits; exact top-k selection) ----
        router_logits = gate_logits(x, self.wg_t)              # (T, E) f32

        # ---- scattermoe grouping: sort rows by expert, pad groups to tiles ----
        tile_expert, tile_valid, padded_token, padded_gates = _routing_and_groups(
            router_logits, x.dtype, T, E, k, tm, n_tiles)

        # ---- gather sorted rows (XLA), grouped GEMM (Pallas), scatter-add ----
        cdt = self.w1_t.dtype
        x_pad = jnp.concatenate([x, jnp.zeros((1, H), x.dtype)], axis=0)  # sentinel row T
        xs = x_pad.astype(cdt)[padded_token]                    # (n_pad, H)

        y = moe_experts_grouped(xs, self.w1_t, self.b1, self.w2_t, self.b2,
                                padded_gates, tile_expert, tile_valid,
                                tm=tm, dc=dc, out_dtype=x.dtype,
                                vmem_limit=budget)              # gate-weighted

        out = jnp.zeros((T + 1, H), x.dtype).at[padded_token].add(y)[:T]
        return out.reshape(original_shape), router_logits


# ----------------------------- pure-JAX reference ------------------------------
def _dense_gates(logits, top_k, num_experts):
    if top_k == 1:
        w = jnp.max(logits, axis=-1, keepdims=True)
        idx = jnp.argmax(logits, axis=-1)[:, None]
    else:
        w, idx = jax.lax.top_k(logits, top_k)
    w = jax.nn.softmax(w.astype(jnp.float32), axis=-1)
    return jnp.sum(jax.nn.one_hot(idx, num_experts, dtype=w.dtype) * w[..., None],
                   axis=1)                                      # (T, E) f32


def reference_forward(moe, hidden_states):
    """Dense MoE reference using the same (possibly bf16) expert weights."""
    x = hidden_states.reshape(-1, moe.hidden_size)
    logits = jnp.dot(x.astype(jnp.float32), moe.wg.T.astype(jnp.float32))
    gates = _dense_gates(logits, moe.top_k, moe.num_experts)    # (T, E) f32
    cdt = moe.w1_t.dtype
    xb = x.astype(cdt)
    out = jnp.zeros(x.shape, jnp.float32)
    for e in range(moe.num_experts):
        h = jnp.dot(xb, moe.w1_t[e], preferred_element_type=jnp.float32) + moe.b1[e]
        h = jax.nn.gelu(h, approximate=True)
        y = jnp.dot(h.astype(cdt), moe.w2_t[e],
                    preferred_element_type=jnp.float32) + moe.b2[e]
        out = out + gates[:, e:e + 1] * y
    return out.astype(x.dtype).reshape(hidden_states.shape), logits


if __name__ == "__main__":
    key = jax.random.PRNGKey(0)
    k_params, k_x = jax.random.split(key)

    num_experts = 4
    top_k = 2
    hidden_size = 32
    intermediate_size = 64
    batch, seq = 2, 8

    moe = MoEPallas(num_experts, top_k, hidden_size, intermediate_size,
                    std=0.02, key=k_params)          # bf16 expert weights by default

    hidden_states = jax.random.normal(k_x, (batch, seq, hidden_size), jnp.float32)

    out, router_logits = moe(hidden_states)
    out = jax.block_until_ready(out)
    router_logits = jax.block_until_ready(router_logits)

    ref_out, ref_logits = reference_forward(moe, hidden_states)
    np.testing.assert_allclose(np.asarray(router_logits), np.asarray(ref_logits),
                               rtol=1e-5, atol=1e-5)
    np.testing.assert_allclose(np.asarray(out), np.asarray(ref_out),
                               rtol=1e-3, atol=1e-3)

    print("KERNEL_OK")
</pallas_src>

<mosaic_0001>
module attributes {stable_mosaic.version = 11 : i64} {
  func.func @_gate_kernel(%arg0: i32, %arg1: memref<16x32xf32, #tpu.memory_space<vmem>>, %arg2: memref<32x4xf32, #tpu.memory_space<vmem>>, %arg3: memref<16x4xf32, #tpu.memory_space<vmem>>) attributes {dimension_semantics = [#tpu.dimension_semantics<parallel>], iteration_bounds = array<i64: 1>, scalar_prefetch = 0 : i64, scratch_operands = 0 : i64, tpu.core_type = #tpu.core_type<tc>, window_params = [{transform_indices = @transform_0, window_bounds = array<i64: 16, 32>}, {pipeline_mode = #tpu.pipeline_mode<synchronous>, transform_indices = @transform_1, window_bounds = array<i64: 32, 4>}, {transform_indices = @transform_2, window_bounds = array<i64: 16, 4>}]} {
    %c0 = arith.constant 0 : index
    %c0_0 = arith.constant 0 : index
    %0 = vector.load %arg1[%c0, %c0_0] : memref<16x32xf32, #tpu.memory_space<vmem>>, vector<16x32xf32>
    %c0_1 = arith.constant 0 : index
    %c0_2 = arith.constant 0 : index
    %1 = vector.load %arg2[%c0_1, %c0_2] : memref<32x4xf32, #tpu.memory_space<vmem>>, vector<32x4xf32>
    %cst = arith.constant dense<0.000000e+00> : vector<16x4xf32>
    %2 = tpu.matmul %0, %1, %cst {dimension_numbers = #tpu.dot_dimension_numbers<[1], [0], [0], [1], [0, 0, 1, 1], [], []>} : vector<16x32xf32>, vector<32x4xf32>, vector<16x4xf32> -> vector<16x4xf32>
    %c0_3 = arith.constant 0 : index
    %c0_4 = arith.constant 0 : index
    %3 = vector.load %arg3[%c0_3, %c0_4] : memref<16x4xf32, #tpu.memory_space<vmem>>, vector<16x4xf32>
    tpu.vector_store %arg3[%c0_3, %c0_4], %2 {strides = array<i32>} : memref<16x4xf32, #tpu.memory_space<vmem>>, vector<16x4xf32>,
    return
  }
  func.func @transform_0(%arg0: i32) -> (i32, i32) {
    %c0_i32 = arith.constant 0 : i32
    %c0_i32_0 = arith.constant 0 : i32
    return %arg0, %c0_i32 : i32, i32
  }
  func.func @transform_1(%arg0: i32) -> (i32, i32) {
    %c0_i32 = arith.constant 0 : i32
    %c0_i32_0 = arith.constant 0 : i32
    %c0_i32_1 = arith.constant 0 : i32
    return %c0_i32, %c0_i32_0 : i32, i32
  }
  func.func @transform_2(%arg0: i32) -> (i32, i32) {
    %c0_i32 = arith.constant 0 : i32
    %c0_i32_0 = arith.constant 0 : i32
    return %arg0, %c0_i32 : i32, i32
  }
}

module attributes {stable_mosaic.version = 11 : i64} {
  func.func @_moe_expert_kernel(%arg0: i32, %arg1: i32, %arg2: memref<6xi32, #tpu.memory_space<smem>>, %arg3: memref<6xi32, #tpu.memory_space<smem>>, %arg4: memref<16x32xbf16, #tpu.memory_space<vmem>>, %arg5: memref<1x32x64xbf16, #tpu.memory_space<vmem>>, %arg6: memref<1x1x64xf32, #tpu.memory_space<vmem>>, %arg7: memref<1x64x32xbf16, #tpu.memory_space<vmem>>, %arg8: memref<1x1x32xf32, #tpu.memory_space<vmem>>, %arg9: memref<16x1xf32, #tpu.memory_space<vmem>>, %arg10: memref<16x32xf32, #tpu.memory_space<vmem>>, %arg11: memref<16x32xf32, #tpu.memory_space<vmem>>) attributes {dimension_semantics = [#tpu.dimension_semantics<parallel>, #tpu.dimension_semantics<arbitrary>], iteration_bounds = array<i64: 6, 1>, scalar_prefetch = 2 : i64, scratch_operands = 1 : i64, tpu.core_type = #tpu.core_type<tc>, window_params = [{transform_indices = @transform_0, window_bounds = array<i64: 16, 32>}, {transform_indices = @transform_1, window_bounds = array<i64: 1, 32, 64>}, {transform_indices = @transform_2, window_bounds = array<i64: 1, 1, 64>}, {transform_indices = @transform_3, window_bounds = array<i64: 1, 64, 32>}, {transform_indices = @transform_4, window_bounds = array<i64: 1, 1, 32>}, {transform_indices = @transform_5, window_bounds = array<i64: 16, 1>}, {transform_indices = @transform_6, window_bounds = array<i64: 16, 32>}]} {
    %c0_i32 = arith.constant 0 : i32
    %0 = arith.cmpi eq, %arg1, %c0_i32 : i32
    %1 = arith.extui %0 : i1 to i32
    %c0_i32_0 = arith.constant 0 : i32
    %2 = arith.cmpi ne, %1, %c0_i32_0 : i32
    scf.if %2 {
      %c0 = arith.constant 0 : index
      %c0_5 = arith.constant 0 : index
      %c0_6 = arith.constant 0 : index
      %11 = vector.load %arg8[%c0, %c0_5, %c0_6] : memref<1x1x32xf32, #tpu.memory_space<vmem>>, vector<1x1x32xf32>
      %12 = vector.shape_cast %11 : vector<1x1x32xf32> to vector<1x32xf32>
      %13 = vector.shape_cast %12 : vector<1x32xf32> to vector<1x32xf32>
      %14 = vector.broadcast %13 : vector<1x32xf32> to vector<16x32xf32>
      %c0_7 = arith.constant 0 : index
      %c0_8 = arith.constant 0 : index
      %15 = vector.load %arg11[%c0_7, %c0_8] : memref<16x32xf32, #tpu.memory_space<vmem>>, vector<16x32xf32>
      tpu.vector_store %arg11[%c0_7, %c0_8], %14 {strides = array<i32>} : memref<16x32xf32, #tpu.memory_space<vmem>>, vector<16x32xf32>,
    } else {
    }
    %3 = arith.index_cast %arg0 : i32 to index
    %4 = memref.load %arg3[%3] : memref<6xi32, #tpu.memory_space<smem>>
    %c0_i32_1 = arith.constant 0 : i32
    %5 = arith.cmpi ne, %4, %c0_i32_1 : i32
    %6 = arith.extui %5 : i1 to i32
    %c0_i32_2 = arith.constant 0 : i32
    %7 = arith.cmpi ne, %6, %c0_i32_2 : i32
    scf.if %7 {
      %c0 = arith.constant 0 : index
      %c0_5 = arith.constant 0 : index
      %11 = vector.load %arg4[%c0, %c0_5] : memref<16x32xbf16, #tpu.memory_space<vmem>>, vector<16x32xbf16>
      %c0_6 = arith.constant 0 : index
      %c0_7 = arith.constant 0 : index
      %c0_8 = arith.constant 0 : index
      %12 = vector.load %arg5[%c0_6, %c0_7, %c0_8] : memref<1x32x64xbf16, #tpu.memory_space<vmem>>, vector<1x32x64xbf16>
      %13 = vector.shape_cast %12 : vector<1x32x64xbf16> to vector<32x64xbf16>
      %cst = arith.constant dense<0.000000e+00> : vector<16x64xf32>
      %14 = tpu.matmul %11, %13, %cst {dimension_numbers = #tpu.dot_dimension_numbers<[1], [0], [0], [1], [0, 0, 1, 1], [], []>} : vector<16x32xbf16>, vector<32x64xbf16>, vector<16x64xf32> -> vector<16x64xf32>
      %c0_9 = arith.constant 0 : index
      %c0_10 = arith.constant 0 : index
      %c0_11 = arith.constant 0 : index
      %15 = vector.load %arg6[%c0_9, %c0_10, %c0_11] : memref<1x1x64xf32, #tpu.memory_space<vmem>>, vector<1x1x64xf32>
      %16 = vector.shape_cast %15 : vector<1x1x64xf32> to vector<1x64xf32>
      %17 = vector.broadcast %16 : vector<1x64xf32> to vector<16x64xf32>
      %18 = arith.addf %14, %17 : vector<16x64xf32>
      %19 = arith.mulf %18, %18 : vector<16x64xf32>
      %20 = arith.mulf %18, %19 : vector<16x64xf32>
      %cst_12 = arith.constant 4.471500e-02 : f32
      %21 = vector.broadcast %cst_12 : f32 to vector<16x64xf32>
      %22 = arith.mulf %21, %20 : vector<16x64xf32>
      %23 = arith.addf %18, %22 : vector<16x64xf32>
      %cst_13 = arith.constant 0.797884583 : f32
      %24 = vector.broadcast %cst_13 : f32 to vector<16x64xf32>
      %25 = arith.mulf %24, %23 : vector<16x64xf32>
      %26 = math.tanh %25 : vector<16x64xf32>
      %cst_14 = arith.constant 1.000000e+00 : f32
      %27 = vector.broadcast %cst_14 : f32 to vector<16x64xf32>
      %28 = arith.addf %27, %26 : vector<16x64xf32>
      %cst_15 = arith.constant 5.000000e-01 : f32
      %29 = vector.broadcast %cst_15 : f32 to vector<16x64xf32>
      %30 = arith.mulf %29, %28 : vector<16x64xf32>
      %31 = arith.mulf %18, %30 : vector<16x64xf32>
      %c0_16 = arith.constant 0 : index
      %c0_17 = arith.constant 0 : index
      %32 = vector.load %arg11[%c0_16, %c0_17] : memref<16x32xf32, #tpu.memory_space<vmem>>, vector<16x32xf32>
      %33 = arith.truncf %31 : vector<16x64xf32> to vector<16x64xbf16>
      %c0_18 = arith.constant 0 : index
      %c0_19 = arith.constant 0 : index
      %c0_20 = arith.constant 0 : index
      %34 = vector.load %arg7[%c0_18, %c0_19, %c0_20] : memref<1x64x32xbf16, #tpu.memory_space<vmem>>, vector<1x64x32xbf16>
      %35 = vector.shape_cast %34 : vector<1x64x32xbf16> to vector<64x32xbf16>
      %cst_21 = arith.constant dense<0.000000e+00> : vector<16x32xf32>
      %36 = tpu.matmul %33, %35, %cst_21 {dimension_numbers = #tpu.dot_dimension_numbers<[1], [0], [0], [1], [0, 0, 1, 1], [], []>} : vector<16x64xbf16>, vector<64x32xbf16>, vector<16x32xf32> -> vector<16x32xf32>
      %37 = arith.addf %32, %36 : vector<16x32xf32>
      %c0_22 = arith.constant 0 : index
      %c0_23 = arith.constant 0 : index
      %38 = vector.load %arg11[%c0_22, %c0_23] : memref<16x32xf32, #tpu.memory_space<vmem>>, vector<16x32xf32>
      tpu.vector_store %arg11[%c0_22, %c0_23], %37 {strides = array<i32>} : memref<16x32xf32, #tpu.memory_space<vmem>>, vector<16x32xf32>,
    } else {
    }
    %c0_i32_3 = arith.constant 0 : i32
    %8 = arith.cmpi eq, %arg1, %c0_i32_3 : i32
    %9 = arith.extui %8 : i1 to i32
    %c0_i32_4 = arith.constant 0 : i32
    %10 = arith.cmpi ne, %9, %c0_i32_4 : i32
    scf.if %10 {
      %c0 = arith.constant 0 : index
      %c0_5 = arith.constant 0 : index
      %11 = vector.load %arg9[%c0, %c0_5] : memref<16x1xf32, #tpu.memory_space<vmem>>, vector<16x1xf32>
      %c0_6 = arith.constant 0 : index
      %c0_7 = arith.constant 0 : index
      %12 = vector.load %arg11[%c0_6, %c0_7] : memref<16x32xf32, #tpu.memory_space<vmem>>, vector<16x32xf32>
      %13 = vector.broadcast %11 : vector<16x1xf32> to vector<16x32xf32>
      %14 = arith.mulf %13, %12 : vector<16x32xf32>
      %c0_8 = arith.constant 0 : index
      %c0_9 = arith.constant 0 : index
      %15 = vector.load %arg10[%c0_8, %c0_9] : memref<16x32xf32, #tpu.memory_space<vmem>>, vector<16x32xf32>
      tpu.vector_store %arg10[%c0_8, %c0_9], %14 {strides = array<i32>} : memref<16x32xf32, #tpu.memory_space<vmem>>, vector<16x32xf32>,
    } else {
    }
    return
  }
  func.func @transform_0(%arg0: i32, %arg1: i32, %arg2: memref<6xi32, #tpu.memory_space<smem>>, %arg3: memref<6xi32, #tpu.memory_space<smem>>) -> (i32, i32) {
    %c0_i32 = arith.constant 0 : i32
    %c0_i32_0 = arith.constant 0 : i32
    return %arg0, %c0_i32 : i32, i32
  }
  func.func @transform_1(%arg0: i32, %arg1: i32, %arg2: memref<6xi32, #tpu.memory_space<smem>>, %arg3: memref<6xi32, #tpu.memory_space<smem>>) -> (i32, i32, i32) {
    %0 = arith.index_cast %arg0 : i32 to index
    %1 = memref.load %arg2[%0] : memref<6xi32, #tpu.memory_space<smem>>
    %c0_i32 = arith.constant 0 : i32
    %c0_i32_0 = arith.constant 0 : i32
    return %1, %c0_i32, %arg1 : i32, i32, i32
  }
  func.func @transform_2(%arg0: i32, %arg1: i32, %arg2: memref<6xi32, #tpu.memory_space<smem>>, %arg3: memref<6xi32, #tpu.memory_space<smem>>) -> (i32, i32, i32) {
    %0 = arith.index_cast %arg0 : i32 to index
    %1 = memref.load %arg2[%0] : memref<6xi32, #tpu.memory_space<smem>>
    %c0_i32 = arith.constant 0 : i32
    %c0_i32_0 = arith.constant 0 : i32
    return %1, %c0_i32, %arg1 : i32, i32, i32
  }
  func.func @transform_3(%arg0: i32, %arg1: i32, %arg2: memref<6xi32, #tpu.memory_space<smem>>, %arg3: memref<6xi32, #tpu.memory_space<smem>>) -> (i32, i32, i32) {
    %0 = arith.index_cast %arg0 : i32 to index
    %1 = memref.load %arg2[%0] : memref<6xi32, #tpu.memory_space<smem>>
    %c0_i32 = arith.constant 0 : i32
    %c0_i32_0 = arith.constant 0 : i32
    return %1, %arg1, %c0_i32 : i32, i32, i32
  }
  func.func @transform_4(%arg0: i32, %arg1: i32, %arg2: memref<6xi32, #tpu.memory_space<smem>>, %arg3: memref<6xi32, #tpu.memory_space<smem>>) -> (i32, i32, i32) {
    %0 = arith.index_cast %arg0 : i32 to index
    %1 = memref.load %arg2[%0] : memref<6xi32, #tpu.memory_space<smem>>
    %c0_i32 = arith.constant 0 : i32
    %c0_i32_0 = arith.constant 0 : i32
    %c0_i32_1 = arith.constant 0 : i32
    return %1, %c0_i32, %c0_i32_0 : i32, i32, i32
  }
  func.func @transform_5(%arg0: i32, %arg1: i32, %arg2: memref<6xi32, #tpu.memory_space<smem>>, %arg3: memref<6xi32, #tpu.memory_space<smem>>) -> (i32, i32) {
    %c0_i32 = arith.constant 0 : i32
    %c0_i32_0 = arith.constant 0 : i32
    return %arg0, %c0_i32 : i32, i32
  }
  func.func @transform_6(%arg0: i32, %arg1: i32, %arg2: memref<6xi32, #tpu.memory_space<smem>>, %arg3: memref<6xi32, #tpu.memory_space<smem>>) -> (i32, i32) {
    %c0_i32 = arith.constant 0 : i32
    %c0_i32_0 = arith.constant 0 : i32
    return %arg0, %c0_i32 : i32, i32
  }
}

</mosaic_0001>

<bundles_post_ra>
// kernel: custom-call.1
= control target key start
LH: loop header
LB: loop body
LE: loop exit
PB: predicated region body
PF: predicated region fallthrough
CT: control target
= control target key end

     0   :  { %s6_s0 = inlined_call_operand.vmem [shape: u32[6], index: 0, kind: output, shape index: {}]  }

// kernel: a_call__.2
= control target key start
LH: loop header
LB: loop body
LE: loop exit
PB: predicated region body
PF: predicated region fallthrough
CT: control target
= control target key end

     0   :  { %vm17_vm0 = vcmask 261120   ;;  %vm47_vm1 = vcmask 31744   ;;  %s99_s1 = inlined_call_operand.vmem [shape: f32[32,4], index: 1, kind: input, shape index: {}]   ;;  %s100_s0 = inlined_call_operand.vmem [shape: f32[16,32], index: 0, kind: input, shape index: {}]   ;;  %s101_s2 = inlined_call_operand.vmem [shape: f32[16,4], index: 2, kind: output, shape index: {}]  }
   0x1   :  { %v16_v0 = vld [vmem:[%s99_s1 + $0x18] sm:$0xff]  ;;  %v15_v1 = vld [vmem:[%s99_s1 + $0x10] sm:$0xff]  ;;  %v14_v2 = vld [vmem:[%s99_s1 + $0x8] sm:$0xff] }
   0x2   :  { %36 = vmatpush.msra.mxu0 %v16_v0  ;;  %56 = vmatpush.msra.mxu1 %v16_v0  ;;  %v13_v3 = vld [vmem:[%s99_s1] sm:$0xff]  ;;  %v12_v5 = vld [vmem:[%s100_s0 + $0x8] sm:$0xff] }
   0x3   :  { %v11_v4 = vld [vmem:[%s100_s0] sm:$0xff] }
   0x4   :  { %37 = vmatpush.msra.mxu0 %v15_v1  ;;  %57 = vmatpush.msra.mxu1 %v15_v1 }
   0x6   :  { %38 = vmatpush.msra.mxu0 %v14_v2  ;;  %58 = vmatpush.msra.mxu1 %v14_v2 }
   0x8   :  { %39 = vmatpush.msra.mxu0 %v13_v3  ;;  %59 = vmatpush.msra.mxu1 %v13_v3 }
   0x9   :  { %54 = vmatmul.msk.f32.vlgmr.msra.gmra.mxu0 %vm17_vm0, %v11_v4  ;;  %55 = vmatmul.msk.f32.vlgmr.msra.gmra.mxu1 %vm17_vm0, %v12_v5 }
  0x86   :  { %v41_v6 = vpop.f32.mrf.mxu0  ;;  %v44_v7 = vpop.f32.mrf.mxu1 }
  0x87   :  { %48 = vst.msk [vmem:[%s101_s2] sm:$0xff] %vm47_vm1, %v41_v6 }
  0x88   :  { %49 = vst.msk [vmem:[%s101_s2 + $0x8] sm:$0xff] %vm47_vm1, %v44_v7 }

// kernel: a_call__.3
= control target key start
LH: loop header
LB: loop body
LE: loop exit
PB: predicated region body
PF: predicated region fallthrough
CT: control target
= control target key end

     0   :  { %s872_s11 = smov [#allocation4]   ;;  %s873_s12 = smov [#allocation5]   ;;  %s1000_s0 = inlined_call_operand.vmem [shape: s32[6], index: 0, kind: input, shape index: {}]   ;;  %s1001_s2 = inlined_call_operand.vmem [shape: bf16[96,32], index: 2, kind: input, shape index: {}]   ;;  %s1002_s3 = inlined_call_operand.vmem [shape: bf16[4,32,64], index: 3, kind: input, shape index: {}]   ;;  %s1003_s4 = inlined_call_operand.vmem [shape: f32[4,1,64], index: 4, kind: input, shape index: {}]   ;;  %s1004_s5 = inlined_call_operand.vmem [shape: bf16[4,64,32], index: 5, kind: input, shape index: {}]   ;;  %s1005_s6 = inlined_call_operand.vmem [shape: f32[4,1,32], index: 6, kind: input, shape index: {}]   ;;  %s1006_s7 = inlined_call_operand.vmem [shape: f32[96,1], index: 7, kind: input, shape index: {}]   ;;  %s1007_s8 = inlined_call_operand.vmem [shape: f32[96,32], index: 8, kind: output, shape index: {}]   ;;  %s1008_s1 = inlined_call_operand.vmem [shape: s32[6], index: 1, kind: input, shape index: {}]  }
   0x1   :  { %1009 = sst [smem:[#allocation7_spill]] %s1001_s2  ;;  %s14_s29 = sshll.u32 %s1000_s0, 4  ;;  %s15_s29 = int_to_ptr.vmem [resolvable:$true] %s14_s29 }
   0x2   :  { %s19_s10 = sshll.u32 %s1008_s1, 4  ;;  %s20_s10 = int_to_ptr.vmem [resolvable:$true] %s19_s10 }
   0x3   :  { %17 = dma.vmem_to_smem %s15_s29, 16, %s872_s11, [#allocation3] }
   0x4   :  { %22 = dma.vmem_to_smem %s20_s10, 16, %s873_s12, [#allocation3] }
   0x5   :  { %858 = dma.done.wait [#allocation3], 32 }
   0x6   :  { %859 = vsyncadd [#allocation3], 4294967264 }
   0x7   :  { %25 = sfence }
   0x8   :  { %s926_s13 = smov 0   ;;  %s928_s14 = smov 0  }
   0x9   :  { %s930_s15 = smov 0  }
   0xa LB: > { %s43_s0 = sadd.s32 1, %s866_s14  ;;  %p735_p0 = scmp.ge.s32.totalorder %s870_s15, 1  ;;  %s870_s15 = sphi %s930_s15, %s31_s15   ;;  %s866_s14 = sphi %s928_s14, %s1012_s14   ;;  %s862_s13 = sphi %s926_s13, %s1011_s13  }
   0xb   : > { %p45_p1 = scmp.ge.s32.totalorder %s43_s0, 6  ;;  %p320_p2 = scmp.lt.s32.totalorder %s870_s15, 7 }
   0xd   : > { %s1014_s0 = smov (%p45_p1, %s43_s0), 0  ;;  %p321_p3 = pnand %p735_p0, %p320_p2 }
   0xe   : > { %s736_s1 = sshll.u32 (!%p321_p3), %s862_s13, 1  ;;  %s391_s16 = sld [smem:[#allocation4 + %s862_s13]] (!%p321_p3) }
   0xf   : > { %324 = sbr.rel (%p321_p3) target bundleno = 475 (0x1db), region = 44  ;;  %p386_p4 = scmp.lt.s32.totalorder (!%p321_p3), %s736_s1, 11 }
  0x10   : > { %s401_s17 = sld [smem:[#allocation4 + %s862_s13]] (!%p321_p3) }
  0x11   : > { %s409_s18 = sld [smem:[#allocation4 + %s862_s13]] (!%p321_p3) }
  0x12   : > { %s421_s19 = sld [smem:[#allocation4 + %s862_s13]] (!%p321_p3) }
  0x13   : > { %s1010_s2 = sld [smem:[#allocation7_spill]] (!%p321_p3) }
  0x14   : > { %s1016_s1 = smov (!%p386_p4, %s736_s1), 11  ;;  %p392_p5 = scmp.lt.s32.totalorder %s391_s16, 3  ;;  %vm447_vm0 = vcmask 261120  }
  0x15   : > { %s737_s20 = sshll.u32 %s1016_s1, 2  ;;  %s743_s21 = sshll.u32 %s1016_s1, 3 }
  0x16   : > { %p402_p6 = scmp.lt.s32.totalorder %s401_s17, 3  ;;  %s957_s27 = scalar_lea.vmem %s1006_s7, %s743_s21 }
  0x17   : > { %s1018_s16 = smov (!%p392_p5, %s391_s16), 3  ;;  %p411_p7 = scmp.lt.s32.totalorder %s409_s18, 3 }
  0x18   : > { %s1020_s17 = smov (!%p402_p6, %s401_s17), 3  ;;  %s779_s28 = sshll.u32 %s1018_s16, 4 }
  0x19   : > { %s389_s24 = scalar_lea.vmem %s1010_s2, %s737_s20  ;;  %s399_s9 = scalar_lea.vmem %s1002_s3, %s779_s28 }
  0x1a   : > { %s407_s12 = scalar_lea.vmem %s1003_s4, %s1020_s17  ;;  %s1022_s18 = smov (!%p411_p7, %s409_s18), 3 }
  0x1b   : > { %p422_p8 = scmp.lt.s32.totalorder %s421_s19, 3  ;;  %s971_s22 = scalar_lea.vmem %s1007_s8, %s743_s21 }
  0x1c   : > { %s780_s23 = sshll.u32 %s1022_s18, 5  ;;  %s450_s25 = sld [smem:[#allocation5 + %s862_s13]] }
  0x1d   : > { %s418_s2 = scalar_lea.vmem %s1004_s5, %s780_s23  ;;  %s1024_s19 = smov (!%p422_p8, %s421_s19), 3 }
  0x1e   : > { %s424_s30 = scalar_lea.vmem %s1005_s6, %s1024_s19 }
  0x1f   : > { %v815_v0 = vld [vmem:[%s424_s30] ss:$0 sm:$0xff] }
  0x20   : > { %448 = vst.msk [vmem:[#allocation2] sm:$0xff] %vm447_vm0, %v815_v0 }
  0x21   : > { %449 = vst.msk [vmem:[#allocation2 + $0x8] sm:$0xff] %vm447_vm0, %v815_v0 }
  0x22   : > { %p746_p9 = scmp.eq.s32.totalorder %s450_s25, 0 }
  0x24   : > { %454 = sbr.rel (%p746_p9) target bundleno = 347 (0x15b), region = 52 }
  0x29   : > { %v783_v1 = vld [vmem:[%s399_s9 + $0x8] sm:$0xff]  ;;  %v782_v2 = vld [vmem:[%s399_s9] sm:$0xff]  ;;  %v787_v4 = vld [vmem:[%s418_s2 + $0x18] sm:$0xff]  ;;  %vm553_vm1 = vcmask 523264  }
  0x2a   : > { %492 = vmatpush.bf16.msra.mxu0 %v783_v1  ;;  %v781_v3 = vld [vmem:[%s389_s24] sm:$0xff]  ;;  %561 = vmatpush.bf16.msra.mxu1 %v787_v4  ;;  %v786_v5 = vld [vmem:[%s418_s2 + $0x10] sm:$0xff]  ;;  %v785_v6 = vld [vmem:[%s418_s2 + $0x8] sm:$0xff] }
  0x2b   : > { %v816_v7 = vld [vmem:[%s407_s12] ss:$0 sm:$0xff]  ;;  %v519_v35 = vld [vmem:[#allocation2 + $0x8] sm:$0xff] }
  0x2c   : > { %v784_v8 = vld [vmem:[%s418_s2] sm:$0xff] }
  0x2d   : > { %v518_v32 = vld [vmem:[#allocation2] sm:$0xff] }
  0x2e   : > { %493 = vmatpush.bf16.msra.mxu0 %v782_v2  ;;  %562 = vmatpush.bf16.msra.mxu1 %v786_v5 }
  0x31   : > { %759 = vmatmul.msk.bf16.vlgmr.msra.gmra.mxu0 %vm447_vm0, %v781_v3 }
  0x32   : > { %563 = vmatpush.bf16.msra.mxu1 %v785_v6 }
  0x36   : > { %564 = vmatpush.bf16.msra.mxu1 %v784_v8 }
  0xae   : > { %v495_v9 = vpop.f32.mrf.mxu0 }
  0xaf   : > { %v496_v10 = vadd.f32 %v816_v7, %v495_v9 }
  0xb1   : > { %v500_v11 = vmul.f32 %v496_v10, %v496_v10 }
  0xb3   : > { %v502_v12 = vmul.f32 %v500_v11, %v496_v10 }
  0xb5   : > { %v504_v13 = vmul.f32 0.044715, %v502_v12 }
  0xb6   : > { %v497_v14 = vpop.f32.mrf.mxu0 }
  0xb7   : > { %v506_v15 = vadd.f32 %v504_v13, %v496_v10  ;;  %v498_v16 = vadd.f32 %v816_v7, %v497_v14 }
  0xb9   : > { %v508_v17 = vmul.f32 0.7978846, %v506_v15  ;;  %v501_v18 = vmul.f32 %v498_v16, %v498_v16 }
  0xbb   : > { %v503_v19 = vmul.f32 %v501_v18, %v498_v16  ;;  %817 = vtanh.f32 %v508_v17 }
  0xbd   : > { %v505_v20 = vmul.f32 0.044715, %v503_v19 }
  0xbf   : > { %v507_v21 = vadd.f32 %v505_v20, %v498_v16 }
  0xc1   : > { %v509_v22 = vmul.f32 0.7978846, %v507_v21  ;;  %v818_v23 = vpop.eup %817 }
  0xc2   : > { %v512_v24 = vadd.f32 1.0, %v818_v23 }
  0xc3   : > { %819 = vtanh.f32 %v509_v22 }
  0xc4   : > { %v514_v27 = vmul.f32 0.5, %v512_v24 }
  0xc6   : > { %v516_v29 = vmul.f32 %v514_v27, %v496_v10 }
  0xc9   : > { %v820_v25 = vpop.eup %819 }
  0xca   : > { %v513_v26 = vadd.f32 1.0, %v820_v25 }
  0xcc   : > { %v515_v28 = vmul.f32 0.5, %v513_v26 }
  0xce   : > { %v517_v30 = vmul.f32 %v515_v28, %v498_v16 }
  0xd0   : > { %v520_v31 = vpack.c.bf16 %v517_v30, %v516_v29 }
  0xd2   : > { %776 = vmatmul.msk.bf16.vlgmr.msra.gmra.mxu1 %vm553_vm1, %v520_v31 }
 0x14f   : > { %v566_v33 = vpop.f32.mrf.mxu1 }
 0x150   : > { %v571_v34 = vadd.f32 %v566_v33, %v518_v32 }
 0x152   : > { %573 = vst.msk [vmem:[#allocation2] sm:$0xff] %vm447_vm0, %v571_v34 }
 0x157   : > { %v568_v36 = vpop.f32.mrf.mxu1 }
 0x158   : > { %v572_v37 = vadd.f32 %v568_v36, %v519_v35 }
 0x15a   : > { %574 = vst.msk [vmem:[#allocation2 + $0x8] sm:$0xff] %vm447_vm0, %v572_v37 }
 0x15b PF: > { %v578_v38 = vld [vmem:[%s957_s27] sm:$0xff]  ;;  %v874_v39 = vmov 0   ;;  %v579_v40 = vld [vmem:[%s957_s27 + $0x8] sm:$0xff] }
 0x15c   : > { %821 = vset.pattern.permute.xlu0 %v874_v39  ;;  %v580_v41 = vld [vmem:[#allocation2] sm:$0xff] }
 0x15d   : > { %584 = vperm.xlu0 %821, %v578_v38  }
 0x161   : > { %v581_v44 = vld [vmem:[#allocation2 + $0x8] sm:$0xff] }
 0x165   : > { %589 = vperm.xlu0 %821, %v579_v40  }
 0x1cf   : > { %v585_v42 = vpop.permute.xlu0 %584 }
 0x1d0   : > { %v592_v43 = vmul.f32 %v585_v42, %v580_v41 }
 0x1d2   : > { %595 = vst.msk [vmem:[%s971_s22] sm:$0xff] %vm447_vm0, %v592_v43 }
 0x1d7   : > { %v590_v45 = vpop.permute.xlu0 %589 }
 0x1d8   : > { %v593_v46 = vmul.f32 %v590_v45, %v581_v44 }
 0x1da   : > { %596 = vst.msk [vmem:[%s971_s22 + $0x8] sm:$0xff] %vm447_vm0, %v593_v46 }
 0x1db PF: > { %s31_s15 = sadd.s32 1, %s870_s15   ;;  %s1011_s13 = smov %s866_s14 }
 0x1dc   : > { %p28_p10 = scmp.ge.s32.totalorder %s31_s15, 8   ;;  %s1012_s14 = smov %s1014_s0 }
 0x1de   :  { %30 = sbr.rel (!%p28_p10) target bundleno = 10 (0xa), region = 101 }

</bundles_post_ra>
